<compile_context>
chip_gen: v5e
topology: v5e:2x2
jax: 0.10.0
libtpu: 0.0.40
codegen_flags: <defaults>
</compile_context>

<pallas_src>
import functools

import jax
import jax.numpy as jnp
from jax.experimental import pallas as pl
from jax.experimental.pallas import tpu as pltpu


def _round_up(x, m):
    return ((x + m - 1) // m) * m


def _reparam(w, alpha):
    """weights = w * |w|**(alpha - 1), with cheap VPU-only special cases."""
    if alpha == 1.0:
        return w
    if alpha == 2.0:
        return w * jnp.abs(w)
    if float(alpha).is_integer() and 1.0 < alpha <= 8.0:
        n = int(alpha) - 1  # exponent on |w|
        aw = jnp.abs(w)
        p = aw
        for _ in range(n - 1):
            p = p * aw
        return w * p
    # General (possibly fractional) alpha: fall back to pow on the EUP.
    return w * jnp.power(jnp.abs(w), alpha - 1.0)


def _pp_linear_kernel(x_ref, wt_ref, b_ref, o_ref, acc_ref, *, alpha):
    k = pl.program_id(2)

    @pl.when(k == 0)
    def _init():
        acc_ref[...] = jnp.zeros_like(acc_ref)

    w_eff = _reparam(wt_ref[...], alpha)                      # (tk, tn), no transpose
    acc_ref[...] += jnp.dot(x_ref[...], w_eff,
                            preferred_element_type=jnp.float32)

    @pl.when(k == pl.num_programs(2) - 1)
    def _finalize():
        o_ref[...] = (acc_ref[...] + b_ref[...]).astype(o_ref.dtype)


def _pp_linear_masked_kernel(x_ref, wt_ref, mt_ref, b_ref, o_ref, acc_ref, *, alpha):
    k = pl.program_id(2)

    @pl.when(k == 0)
    def _init():
        acc_ref[...] = jnp.zeros_like(acc_ref)

    w_eff = _reparam(wt_ref[...], alpha) * mt_ref[...]        # (tk, tn)
    acc_ref[...] += jnp.dot(x_ref[...], w_eff,
                            preferred_element_type=jnp.float32)

    @pl.when(k == pl.num_programs(2) - 1)
    def _finalize():
        o_ref[...] = (acc_ref[...] + b_ref[...]).astype(o_ref.dtype)


def powerprop_linear(x, w, b, alpha, mask=None):
    """Pallas TPU implementation of PowerPropLinear.forward.

    x:    (batch, in_features) float32
    w:    (out_features, in_features) float32
    b:    (out_features,) float32
    mask: optional (out_features, in_features) float32 multiplicative mask
    """
    batch, in_features = x.shape
    out_features, in_features_w = w.shape
    assert in_features == in_features_w

    # Tile sizes: lane-dense output (tn >= 128), MXU-friendly 256 blocks when the
    # problem is big enough, tm a multiple of 8.  With tm=tn=256, tk=512 the
    # double-buffered VMEM footprint is ~4 MiB -- safe on v5e (16 MiB scoped
    # default), v6e and v7x (64 MiB physical).
    tm = 256 if batch >= 256 else _round_up(batch, 8)
    tn = 256 if out_features >= 256 else _round_up(max(out_features, 128), 128)
    tk = 512 if in_features >= 512 else _round_up(max(in_features, 128), 128)

    m_pad = _round_up(batch, tm)
    n_pad = _round_up(out_features, tn)
    k_pad = _round_up(in_features, tk)

    x_p = jnp.pad(x, ((0, m_pad - batch), (0, k_pad - in_features)))
    # Pad the transposed weight with 1.0 so |w|**(alpha-1) stays finite even for
    # alpha < 1; padded K columns of x are zero, so padding contributes nothing,
    # and padded N columns are sliced off below.
    w_t = jnp.pad(w.T, ((0, k_pad - in_features), (0, n_pad - out_features)),
                  constant_values=1.0)
    b_p = jnp.pad(b, (0, n_pad - out_features)).reshape(1, n_pad)

    grid = (m_pad // tm, n_pad // tn, k_pad // tk)

    x_spec = pl.BlockSpec((tm, tk), lambda i, j, k: (i, k))
    w_spec = pl.BlockSpec((tk, tn), lambda i, j, k: (k, j))
    m_spec = pl.BlockSpec((tk, tn), lambda i, j, k: (k, j))
    b_spec = pl.BlockSpec((1, tn), lambda i, j, k: (0, j))
    o_spec = pl.BlockSpec((tm, tn), lambda i, j, k: (i, j))

    compiler_params = pltpu.CompilerParams(
        dimension_semantics=("parallel", "parallel", "arbitrary"),
        vmem_limit_bytes=32 * 1024 * 1024,
    )

    if mask is None:
        kernel = functools.partial(_pp_linear_kernel, alpha=float(alpha))
        in_specs = [x_spec, w_spec, b_spec]
        operands = (x_p, w_t, b_p)
    else:
        mask_t = jnp.pad(mask.T,
                         ((0, k_pad - in_features), (0, n_pad - out_features)))
        kernel = functools.partial(_pp_linear_masked_kernel, alpha=float(alpha))
        in_specs = [x_spec, w_spec, m_spec, b_spec]
        operands = (x_p, w_t, mask_t, b_p)

    out_p = pl.pallas_call(
        kernel,
        out_shape=jax.ShapeDtypeStruct((m_pad, n_pad), x.dtype),
        grid_spec=pltpu.PrefetchScalarGridSpec(
            num_scalar_prefetch=0,
            grid=grid,
            in_specs=in_specs,
            out_specs=o_spec,
            scratch_shapes=[pltpu.VMEM((tm, tn), jnp.float32)],
        ),
        compiler_params=compiler_params,
    )(*operands)

    return out_p[:batch, :out_features]


def powerprop_linear_ref(x, w, b, alpha, mask=None):
    """Pure-JAX reference mirroring the PyTorch module."""
    w_eff = w * jnp.power(jnp.abs(w), alpha - 1.0)
    if mask is not None:
        w_eff = w_eff * mask
    return x @ w_eff.T + b


if __name__ == "__main__":
    key = jax.random.PRNGKey(0)

    # --- Small case (module demo shapes): batch=8, in=32, out=16, alpha=2 ---
    alpha = 2.0
    batch, in_features, out_features = 8, 32, 16
    kx, kw, kb, km, key = jax.random.split(key, 5)
    x = jax.random.normal(kx, (batch, in_features), dtype=jnp.float32)
    w = jax.random.normal(kw, (out_features, in_features), dtype=jnp.float32) * 0.1
    b = jax.random.normal(kb, (out_features,), dtype=jnp.float32) * 0.01
    mask = (jax.random.uniform(km, (out_features, in_features)) > 0.3).astype(jnp.float32)

    out = jax.block_until_ready(powerprop_linear(x, w, b, alpha))
    ref = powerprop_linear_ref(x, w, b, alpha)
    assert jnp.allclose(out, ref, atol=1e-4, rtol=1e-4), "mismatch (small, no mask)"

    out_m = jax.block_until_ready(powerprop_linear(x, w, b, alpha, mask=mask))
    ref_m = powerprop_linear_ref(x, w, b, alpha, mask=mask)
    assert jnp.allclose(out_m, ref_m, atol=1e-4, rtol=1e-4), "mismatch (small, masked)"

    # --- Larger case exercising the multi-block grid + padding: alpha=3 -----
    alpha2 = 3.0
    batch2, in2, out2 = 72, 640, 320   # grid = (1, 2, 2) with padding in all dims
    kx2, kw2, kb2, km2, key = jax.random.split(key, 5)
    x2 = jax.random.normal(kx2, (batch2, in2), dtype=jnp.float32)
    w2 = jax.random.normal(kw2, (out2, in2), dtype=jnp.float32) * 0.1
    b2 = jax.random.normal(kb2, (out2,), dtype=jnp.float32) * 0.01
    mask2 = (jax.random.uniform(km2, (out2, in2)) > 0.3).astype(jnp.float32)

    out2_nm = jax.block_until_ready(powerprop_linear(x2, w2, b2, alpha2))
    ref2_nm = powerprop_linear_ref(x2, w2, b2, alpha2)
    assert jnp.allclose(out2_nm, ref2_nm, atol=1e-4, rtol=1e-4), "mismatch (large, no mask)"

    out2_m = jax.block_until_ready(powerprop_linear(x2, w2, b2, alpha2, mask=mask2))
    ref2_m = powerprop_linear_ref(x2, w2, b2, alpha2, mask=mask2)
    assert jnp.allclose(out2_m, ref2_m, atol=1e-4, rtol=1e-4), "mismatch (large, masked)"

    print("KERNEL_OK")
</pallas_src>

<mosaic_0001>
module attributes {stable_mosaic.version = 11 : i64} {
  func.func @_pp_linear_kernel(%arg0: i32, %arg1: i32, %arg2: i32, %arg3: memref<8x128xf32, #tpu.memory_space<vmem>>, %arg4: memref<128x128xf32, #tpu.memory_space<vmem>>, %arg5: memref<1x128xf32, #tpu.memory_space<vmem>>, %arg6: memref<8x128xf32, #tpu.memory_space<vmem>>, %arg7: memref<8x128xf32, #tpu.memory_space<vmem>>) attributes {dimension_semantics = [#tpu.dimension_semantics<parallel>, #tpu.dimension_semantics<parallel>, #tpu.dimension_semantics<arbitrary>], iteration_bounds = array<i64: 1, 1, 1>, scalar_prefetch = 0 : i64, scratch_operands = 1 : i64, tpu.core_type = #tpu.core_type<tc>, window_params = [{transform_indices = @transform_0, window_bounds = array<i64: 8, 128>}, {transform_indices = @transform_1, window_bounds = array<i64: 128, 128>}, {transform_indices = @transform_2, window_bounds = array<i64: 1, 128>}, {transform_indices = @transform_3, window_bounds = array<i64: 8, 128>}]} {
    %c0_i32 = arith.constant 0 : i32
    %0 = arith.cmpi eq, %arg2, %c0_i32 : i32
    %1 = arith.extui %0 : i1 to i32
    %c0_i32_0 = arith.constant 0 : i32
    %2 = arith.cmpi ne, %1, %c0_i32_0 : i32
    scf.if %2 {
      %cst_10 = arith.constant 0.000000e+00 : f32
      %14 = vector.broadcast %cst_10 : f32 to vector<8x128xf32>
      %c0_11 = arith.constant 0 : index
      %c0_12 = arith.constant 0 : index
      %15 = vector.load %arg7[%c0_11, %c0_12] : memref<8x128xf32, #tpu.memory_space<vmem>>, vector<8x128xf32>
      tpu.vector_store %arg7[%c0_11, %c0_12], %14 {strides = array<i32>} : memref<8x128xf32, #tpu.memory_space<vmem>>, vector<8x128xf32>,
    } else {
    }
    %c0 = arith.constant 0 : index
    %c0_1 = arith.constant 0 : index
    %3 = vector.load %arg4[%c0, %c0_1] : memref<128x128xf32, #tpu.memory_space<vmem>>, vector<128x128xf32>
    %4 = math.absf %3 : vector<128x128xf32>
    %5 = arith.mulf %3, %4 : vector<128x128xf32>
    %c0_2 = arith.constant 0 : index
    %c0_3 = arith.constant 0 : index
    %6 = vector.load %arg7[%c0_2, %c0_3] : memref<8x128xf32, #tpu.memory_space<vmem>>, vector<8x128xf32>
    %c0_4 = arith.constant 0 : index
    %c0_5 = arith.constant 0 : index
    %7 = vector.load %arg3[%c0_4, %c0_5] : memref<8x128xf32, #tpu.memory_space<vmem>>, vector<8x128xf32>
    %cst = arith.constant dense<0.000000e+00> : vector<8x128xf32>
    %8 = tpu.matmul %7, %5, %cst {dimension_numbers = #tpu.dot_dimension_numbers<[1], [0], [0], [1], [0, 0, 1, 1], [], []>} : vector<8x128xf32>, vector<128x128xf32>, vector<8x128xf32> -> vector<8x128xf32>
    %9 = arith.addf %6, %8 : vector<8x128xf32>
    %c0_6 = arith.constant 0 : index
    %c0_7 = arith.constant 0 : index
    %10 = vector.load %arg7[%c0_6, %c0_7] : memref<8x128xf32, #tpu.memory_space<vmem>>, vector<8x128xf32>
    tpu.vector_store %arg7[%c0_6, %c0_7], %9 {strides = array<i32>} : memref<8x128xf32, #tpu.memory_space<vmem>>, vector<8x128xf32>,
    %c0_i32_8 = arith.constant 0 : i32
    %11 = arith.cmpi eq, %arg2, %c0_i32_8 : i32
    %12 = arith.extui %11 : i1 to i32
    %c0_i32_9 = arith.constant 0 : i32
    %13 = arith.cmpi ne, %12, %c0_i32_9 : i32
    scf.if %13 {
      %c0_10 = arith.constant 0 : index
      %c0_11 = arith.constant 0 : index
      %14 = vector.load %arg7[%c0_10, %c0_11] : memref<8x128xf32, #tpu.memory_space<vmem>>, vector<8x128xf32>
      %c0_12 = arith.constant 0 : index
      %c0_13 = arith.constant 0 : index
      %15 = vector.load %arg5[%c0_12, %c0_13] : memref<1x128xf32, #tpu.memory_space<vmem>>, vector<1x128xf32>
      %16 = vector.broadcast %15 : vector<1x128xf32> to vector<8x128xf32>
      %17 = arith.addf %14, %16 : vector<8x128xf32>
      %c0_14 = arith.constant 0 : index
      %c0_15 = arith.constant 0 : index
      %18 = vector.load %arg6[%c0_14, %c0_15] : memref<8x128xf32, #tpu.memory_space<vmem>>, vector<8x128xf32>
      tpu.vector_store %arg6[%c0_14, %c0_15], %17 {strides = array<i32>} : memref<8x128xf32, #tpu.memory_space<vmem>>, vector<8x128xf32>,
    } else {
    }
    return
  }
  func.func @transform_0(%arg0: i32, %arg1: i32, %arg2: i32) -> (i32, i32) {
    %c0_i32 = arith.constant 0 : i32
    return %arg0, %arg2 : i32, i32
  }
  func.func @transform_1(%arg0: i32, %arg1: i32, %arg2: i32) -> (i32, i32) {
    %c0_i32 = arith.constant 0 : i32
    return %arg2, %arg1 : i32, i32
  }
  func.func @transform_2(%arg0: i32, %arg1: i32, %arg2: i32) -> (i32, i32) {
    %c0_i32 = arith.constant 0 : i32
    %c0_i32_0 = arith.constant 0 : i32
    return %c0_i32, %arg1 : i32, i32
  }
  func.func @transform_3(%arg0: i32, %arg1: i32, %arg2: i32) -> (i32, i32) {
    %c0_i32 = arith.constant 0 : i32
    return %arg0, %arg1 : i32, i32
  }
}

</mosaic_0001>

<bundles_post_ra>
// kernel: tpu_custom_call.1
= control target key start
LH: loop header
LB: loop body
LE: loop exit
PB: predicated region body
PF: predicated region fallthrough
CT: control target
= control target key end

     0   :  { %8 = vsyncpa [#allocation4], 0  ;;  %s271_s0 = inlined_call_operand.hbm [shape: f32[8,128], index: 0, kind: input, shape index: {}]   ;;  %s272_s1 = inlined_call_operand.hbm [shape: f32[128,128], index: 1, kind: input, shape index: {}]   ;;  %s273_s2 = inlined_call_operand.vmem [shape: f32[1,128], index: 2, kind: input, shape index: {}]   ;;  %s274_s3 = inlined_call_operand.hbm [shape: f32[8,128], index: 3, kind: output, shape index: {}]  }
   0x1   :  { %9 = vsyncpa [#allocation7], 0 }
   0x2   :  { %10 = vsyncpa [#allocation5], 0  ;;  %s16_s14 = sshll.u32 %s271_s0, 4  ;;  %s234_s15 = smov [#allocation3]   ;;  %s17_s14 = int_to_ptr.hbm [resolvable:$true] %s16_s14 }
   0x3   :  { %s18_s16 = sshll.u32 %s234_s15, 4  ;;  %s26_s19 = sshll.u32 %s272_s1, 4  ;;  %s19_s16 = int_to_ptr.vmem [resolvable:$true] %s18_s16  ;;  %s27_s19 = int_to_ptr.hbm [resolvable:$true] %s26_s19 }
   0x4   :  { %21 = dma.hbm_to_vmem [thread:$0]  %s17_s14, 128, %s19_s16, [#allocation4]  }
   0x5   :  { %s235_s20 = smov [#allocation6]   ;;  %s236_s22 = smov 128  }
   0x6   :  { %s28_s21 = sshll.u32 %s235_s20, 4  ;;  %s237_s23 = smov 8   ;;  %s29_s21 = int_to_ptr.vmem [resolvable:$true] %s28_s21 }
   0x7   :  { %34 = dma.hbm_to_vmem [thread:$0]  %s27_s19, 2048, %s29_s21, [#allocation7], %s236_s22, %s236_s22, %s237_s23  }
   0x8   :  { %228 = dma.done.wait [#allocation4], 128  }
   0x9   :  { %229 = vsyncadd [#allocation4], 4294967168 }
   0xa   :  { %230 = dma.done.wait [#allocation7], 2048  }
   0xb   :  { %231 = vsyncadd [#allocation7], 4294965248  ;;  %v65_v0 = vld [vmem:[#allocation6 + $0x78] sm:$0xff]  ;;  %v64_v1 = vld [vmem:[#allocation6 + $0x70] sm:$0xff]  ;;  %s238_s24 = smov [#allocation8]   ;;  %s139_s28 = sshll.u32 %s274_s3, 4  ;;  %s140_s28 = int_to_ptr.hbm [resolvable:$true] %s139_s28 }
   0xc   :  { %v63_v2 = vld [vmem:[#allocation6 + $0x68] sm:$0xff]  ;;  %v81_v3 = vand.u32 2147483647, %v65_v0  ;;  %v80_v4 = vand.u32 2147483647, %v64_v1  ;;  %v62_v6 = vld [vmem:[#allocation6 + $0x60] sm:$0xff] }
   0xd   :  { %v79_v5 = vand.u32 2147483647, %v63_v2  ;;  %v61_v7 = vld [vmem:[#allocation6 + $0x58] sm:$0xff]  ;;  %v78_v10 = vand.u32 2147483647, %v62_v6  ;;  %v60_v11 = vld [vmem:[#allocation6 + $0x50] sm:$0xff] }
   0xe   :  { %v97_v8 = vmul.f32 %v81_v3, %v65_v0  ;;  %v96_v9 = vmul.f32 %v80_v4, %v64_v1  ;;  %v77_v13 = vand.u32 2147483647, %v61_v7  ;;  %v59_v14 = vld [vmem:[#allocation6 + $0x48] sm:$0xff]  ;;  %v76_v16 = vand.u32 2147483647, %v60_v11  ;;  %v58_v17 = vld [vmem:[#allocation6 + $0x40] sm:$0xff] }
   0xf   :  { %v95_v12 = vmul.f32 %v79_v5, %v63_v2  ;;  %v94_v15 = vmul.f32 %v78_v10, %v62_v6  ;;  %v75_v19 = vand.u32 2147483647, %v59_v14  ;;  %v57_v20 = vld [vmem:[#allocation6 + $0x38] sm:$0xff]  ;;  %v74_v22 = vand.u32 2147483647, %v58_v17  ;;  %v56_v23 = vld [vmem:[#allocation6 + $0x30] sm:$0xff] }
  0x10   :  { %100 = vmatpush.msra.mxu0 %v97_v8  ;;  %v93_v18 = vmul.f32 %v77_v13, %v61_v7  ;;  %v92_v21 = vmul.f32 %v76_v16, %v60_v11  ;;  %v73_v25 = vand.u32 2147483647, %v57_v20  ;;  %v55_v26 = vld [vmem:[#allocation6 + $0x28] sm:$0xff]  ;;  %v72_v28 = vand.u32 2147483647, %v56_v23  ;;  %v54_v29 = vld [vmem:[#allocation6 + $0x20] sm:$0xff] }
  0x11   :  { %v91_v24 = vmul.f32 %v75_v19, %v59_v14  ;;  %v90_v27 = vmul.f32 %v74_v22, %v58_v17  ;;  %v71_v31 = vand.u32 2147483647, %v55_v26  ;;  %v53_v32 = vld [vmem:[#allocation6 + $0x18] sm:$0xff]  ;;  %v70_v34 = vand.u32 2147483647, %v54_v29  ;;  %v52_v35 = vld [vmem:[#allocation6 + $0x10] sm:$0xff] }
  0x12   :  { %101 = vmatpush.msra.mxu0 %v96_v9  ;;  %v89_v30 = vmul.f32 %v73_v25, %v57_v20  ;;  %v88_v33 = vmul.f32 %v72_v28, %v56_v23  ;;  %v69_v37 = vand.u32 2147483647, %v53_v32  ;;  %v51_v38 = vld [vmem:[#allocation6 + $0x8] sm:$0xff]  ;;  %v68_v40 = vand.u32 2147483647, %v52_v35  ;;  %v50_v41 = vld [vmem:[#allocation6] sm:$0xff] }
  0x13   :  { %v87_v36 = vmul.f32 %v71_v31, %v55_v26  ;;  %v86_v39 = vmul.f32 %v70_v34, %v54_v29  ;;  %v67_v43 = vand.u32 2147483647, %v51_v38  ;;  %v66_v45 = vand.u32 2147483647, %v50_v41  ;;  %v99_v48 = vld [vmem:[#allocation3] sm:$0xff]  ;;  %s137_s25 = sshll.u32 %s238_s24, 4  ;;  %s138_s25 = int_to_ptr.vmem [resolvable:$true] %s137_s25 }
  0x14   :  { %102 = vmatpush.msra.mxu0 %v95_v12  ;;  %v85_v42 = vmul.f32 %v69_v37, %v53_v32  ;;  %v84_v44 = vmul.f32 %v68_v40, %v52_v35  ;;  %v155_v49 = vld [vmem:[%s273_s2] ss:$0 sm:$0xff] }
  0x15   :  { %v83_v46 = vmul.f32 %v67_v43, %v51_v38  ;;  %v82_v47 = vmul.f32 %v66_v45, %v50_v41 }
  0x16   :  { %103 = vmatpush.msra.mxu0 %v94_v15 }
  0x18   :  { %104 = vmatpush.msra.mxu0 %v93_v18 }
  0x1a   :  { %105 = vmatpush.msra.mxu0 %v92_v21 }
  0x1c   :  { %106 = vmatpush.msra.mxu0 %v91_v24 }
  0x1e   :  { %107 = vmatpush.msra.mxu0 %v90_v27 }
  0x20   :  { %108 = vmatpush.msra.mxu0 %v89_v30 }
  0x22   :  { %109 = vmatpush.msra.mxu0 %v88_v33 }
  0x24   :  { %110 = vmatpush.msra.mxu0 %v87_v36 }
  0x26   :  { %111 = vmatpush.msra.mxu0 %v86_v39 }
  0x28   :  { %112 = vmatpush.msra.mxu0 %v85_v42 }
  0x2a   :  { %113 = vmatpush.msra.mxu0 %v84_v44 }
  0x2c   :  { %114 = vmatpush.msra.mxu0 %v83_v46 }
  0x2e   :  { %115 = vmatpush.msra.mxu0 %v82_v47 }
  0x2f   :  { %116 = vmatmul.f32.vlgmr.msra.gmra.mxu0 %v99_v48 }
  0xac   :  { %v117_v50 = vpop.f32.mrf.mxu0 }
  0xad   :  { %v130_v51 = vadd.f32 %v155_v49, %v117_v50 }
  0xaf   :  { %131 = vst [vmem:[#allocation8] sm:$0xff] %v130_v51 }
  0xb0   :  { %142 = dma.vmem_to_hbm [thread:$0]  %s138_s25, 128, %s140_s28, [#allocation5]  }
  0xb1   :  { %232 = dma.done.wait [#allocation5], 128  }
  0xb2   :  { %233 = vsyncadd [#allocation5], 4294967168 }
  0xb3   :  { %147 = vsyncpa [#allocation4], 1 }
  0xb4   :  { %148 = vsyncpa [#allocation7], 1 }
  0xb5   :  { %149 = vsyncpa [#allocation5], 1 }

</bundles_post_ra>
